<compile_context>
chip_gen: v5e
topology: v5e:2x2
jax: 0.10.0
libtpu: 0.0.40
codegen_flags: <defaults>
</compile_context>

<pallas_src>
import jax
import jax.numpy as jnp
from jax.experimental import pallas as pl
from jax.experimental.pallas import tpu as pltpu


def _hbm_copy_kernel(x_hbm_ref, o_hbm_ref, sem):
    # Single HBM->HBM DMA of the whole parameter tensor.
    cp = pltpu.make_async_copy(x_hbm_ref, o_hbm_ref, sem)
    cp.start()
    cp.wait()


def dummy_generator_forward(param: jax.Array) -> jax.Array:
    """Returns the parameter tensor, materialized via one HBM->HBM DMA.

    param: the module's (1, 2, 1024, 128) parameter (any dtype / shape); the
    whole tensor is copied in a single kernel invocation with no VMEM staging.
    """
    nbytes = param.size * param.dtype.itemsize
    return pl.pallas_call(
        _hbm_copy_kernel,
        out_shape=jax.ShapeDtypeStruct(param.shape, param.dtype),
        # Keep both operands in HBM; the kernel drives the DMA itself.
        in_specs=[pl.BlockSpec(memory_space=pl.ANY)],
        out_specs=pl.BlockSpec(memory_space=pl.ANY),
        scratch_shapes=[pltpu.SemaphoreType.DMA(())],
        cost_estimate=pl.CostEstimate(
            flops=0,
            transcendentals=0,
            bytes_accessed=2 * nbytes,  # one read + one write of the tensor
        ),
    )(param)


if __name__ == "__main__":
    key = jax.random.PRNGKey(0)
    # Deterministic init analogous to nn.Parameter(torch.rand((1, 2, 1024, 128))):
    # uniform in [0, 1).  (Distribution matches; PRNG streams differ from torch.)
    dummy_tensor = jax.random.uniform(
        key, (1, 2, 1024, 128), dtype=jnp.float32, minval=0.0, maxval=1.0
    )

    out = dummy_generator_forward(dummy_tensor)
    out = jax.block_until_ready(out)

    assert out.shape == (1, 2, 1024, 128)
    assert out.dtype == jnp.float32
    # Pure copy -> bit-exact.
    assert bool(jnp.array_equal(out, dummy_tensor)), "kernel output mismatch"

    print("KERNEL_OK")
</pallas_src>

<mosaic_0001>
module attributes {stable_mosaic.version = 11 : i64} {
  func.func @_hbm_copy_kernel(%arg0: memref<1x2x1024x128xf32, #tpu.memory_space<any>>, %arg1: memref<1x2x1024x128xf32, #tpu.memory_space<any>>, %arg2: memref<!tpu.dma_semaphore, #tpu.memory_space<semaphore_mem>>) attributes {dimension_semantics = [], scalar_prefetch = 0 : i64, scratch_operands = 1 : i64, tpu.core_type = #tpu.core_type<tc>} {
    tpu.enqueue_dma source(%arg0 : memref<1x2x1024x128xf32, #tpu.memory_space<any>>) target(%arg1 : memref<1x2x1024x128xf32, #tpu.memory_space<any>>) target_semaphore(%arg2 : memref<!tpu.dma_semaphore, #tpu.memory_space<semaphore_mem>>)
    tpu.wait_dma2 semaphore(%arg2 : memref<!tpu.dma_semaphore, #tpu.memory_space<semaphore_mem>>) src(%arg0 : memref<1x2x1024x128xf32, #tpu.memory_space<any>>) dst(%arg1 : memref<1x2x1024x128xf32, #tpu.memory_space<any>>)
    return
  }
}

</mosaic_0001>

<bundles_post_ra>
// kernel: tpu_custom_call.1
= control target key start
LH: loop header
LB: loop body
LE: loop exit
PB: predicated region body
PF: predicated region fallthrough
CT: control target
= control target key end

     0   :  { %s34_s12 = smov [#allocation2]   ;;  %s35_s13 = smov [#allocation3]   ;;  %s53_s0 = inlined_call_operand.hbm [shape: f32[1,2,1024,128], index: 0, kind: input, shape index: {}]   ;;  %s54_s1 = inlined_call_operand.hbm [shape: f32[1,2,1024,128], index: 1, kind: output, shape index: {}]  }
   0x1   :  { %s10_s8 = sshll.u32 %s53_s0, 4  ;;  %s12_s11 = sshll.u32 %s54_s1, 4  ;;  %s11_s8 = int_to_ptr.hbm [resolvable:$true] %s10_s8  ;;  %s13_s11 = int_to_ptr.hbm [resolvable:$true] %s12_s11 }
   0x2   :  { %s36_s14 = smov 0  }
   0x3   :  { %16 = dma.general %s11_s8, 32768, %s13_s11, %s34_s12, %s35_s13, [#allocation4], %s36_s14, 0  }
   0x4   :  { %32 = dma.done.wait [#allocation2], 32768 }
   0x5   :  { %33 = vsyncadd [#allocation2], 4294934528 }
   0x6   :  { %22 = vsyncmov [#allocation2] }
   0x9   :  { %s23_s15 = vpop.sfrf %22 }
   0xa   :  { %p28_p0 = scmp.ne.s32.totalorder %s23_s15, 0 }
   0xc   :  { %27 = shalt.err (%p28_p0)  }

</bundles_post_ra>
